<compile_context>
chip_gen: v5e
topology: v5e:2x2
jax: 0.10.0
libtpu: 0.0.40
codegen_flags: <defaults>
</compile_context>

<pallas_src>
import jax
import jax.numpy as jnp
from jax import lax
from jax.experimental import pallas as pl
from jax.experimental.pallas import tpu as pltpu

EPS = 1e-5


def _round_up(x, m):
    return (x + m - 1) // m * m


def _choose_tiles(L):
    """Returns (tq, tk, Lp): flash tile sizes and the padded sequence length."""
    lp8 = _round_up(max(L, 8), 8)
    if lp8 <= 512:                      # short sequences: one tile covers everything
        return lp8, lp8, lp8
    tile = 256
    return tile, tile, _round_up(L, tile)


# ----------------------------------------------------------------------------
# Kernel 1: BatchNorm1d batch statistics.
# x is flattened to (rows, Cp) with rows = B*Lp (zero padding rows do not change
# the sums).  Row-tiled grid, accumulated into a VMEM-resident (1, Cp) output.
# ----------------------------------------------------------------------------
def _stats_kernel(x_ref, sum_ref, sumsq_ref):
    @pl.when(pl.program_id(0) == 0)
    def _():
        sum_ref[...] = jnp.zeros_like(sum_ref)
        sumsq_ref[...] = jnp.zeros_like(sumsq_ref)

    xb = x_ref[...]                                         # (rt, Cp) f32
    sum_ref[...] += jnp.sum(xb, axis=0, keepdims=True)
    sumsq_ref[...] += jnp.sum(xb * xb, axis=0, keepdims=True)


# ----------------------------------------------------------------------------
# Kernel 2: fused  BN-fold -> q/k/v (1x1 conv) -> flash attention -> proj -> residual.
# Grid (B, nq, nk); kv axis is innermost ("arbitrary"), online softmax in scratch.
# ----------------------------------------------------------------------------
def _make_attn_kernel(tq, tk, l_true, l_pad):
    mask_keys = l_pad > l_true

    def kernel(xq_ref, xk_ref, scale_ref, shift_ref,
               wq_ref, wk_ref, wv_ref, wp_ref, bias_ref,
               o_ref, q_scr, acc_scr, m_scr, l_scr):
        ki = pl.program_id(2)
        nk = pl.num_programs(2)

        # Hoisted reads of the small resident vectors (read once per step).
        scale = scale_ref[...]                              # (1, Cp) f32
        shift = shift_ref[...]                              # (1, Cp) f32
        biases = bias_ref[...]                              # (4, Cp) f32

        @pl.when(ki == 0)
        def _():
            xq = xq_ref[0]                                  # (tq, Cp) f32
            hq = (xq * scale + shift).astype(jnp.bfloat16)
            # Wq is pre-transposed and pre-scaled by C**-0.5 on the host.
            q = jnp.dot(hq, wq_ref[...],
                        preferred_element_type=jnp.float32) + biases[0:1]
            q_scr[...] = q.astype(jnp.bfloat16)
            acc_scr[...] = jnp.zeros_like(acc_scr)
            m_scr[...] = jnp.full((tq, 1), -jnp.inf, jnp.float32)
            l_scr[...] = jnp.zeros_like(l_scr)

        xk = xk_ref[0]                                      # (tk, Cp) f32
        hk = (xk * scale + shift).astype(jnp.bfloat16)
        k = (jnp.dot(hk, wk_ref[...],
                     preferred_element_type=jnp.float32) + biases[1:2]).astype(jnp.bfloat16)
        v = (jnp.dot(hk, wv_ref[...],
                     preferred_element_type=jnp.float32) + biases[2:3]).astype(jnp.bfloat16)

        # scores (tq, tk): contract the channel axes directly — no in-kernel transpose.
        s = lax.dot_general(q_scr[...], k, (((1,), (1,)), ((), ())),
                            preferred_element_type=jnp.float32)
        if mask_keys:
            key_pos = ki * tk + lax.broadcasted_iota(jnp.int32, (tq, tk), 1)
            s = jnp.where(key_pos < l_true, s, -jnp.inf)

        m_prev = m_scr[...]
        m_new = jnp.maximum(m_prev, jnp.max(s, axis=-1, keepdims=True))
        alpha = jnp.exp(m_prev - m_new)
        p = jnp.exp(s - m_new)
        l_scr[...] = alpha * l_scr[...] + jnp.sum(p, axis=-1, keepdims=True)
        acc_scr[...] = alpha * acc_scr[...] + jnp.dot(
            p.astype(jnp.bfloat16), v, preferred_element_type=jnp.float32)
        m_scr[...] = m_new

        @pl.when(ki == nk - 1)
        def _():
            # one reciprocal per row (EUP) instead of an (L, L) divide
            out = acc_scr[...] * pl.reciprocal(l_scr[...], approx=True)
            proj = jnp.dot(out.astype(jnp.bfloat16), wp_ref[...],
                           preferred_element_type=jnp.float32) + biases[3:4]
            o_ref[0] = (xq_ref[0] + proj).astype(o_ref.dtype)

    return kernel


def attn_block(x_ncl, params):
    """Forward pass of AttnBlock. x_ncl: (B, C, L) float32 (PyTorch Conv1d layout)."""
    B, C, L = x_ncl.shape
    Cp = _round_up(C, 128)
    tq, tk, Lp = _choose_tiles(L)

    # Interface transposes only (a full model would stay in (B, L, C)).
    x = jnp.transpose(x_ncl, (0, 2, 1)).astype(jnp.float32)          # (B, L, C)
    x_p = jnp.pad(x, ((0, 0), (0, Lp - L), (0, Cp - C)))             # (B, Lp, Cp)

    # ---- BatchNorm1d batch statistics (train mode, biased variance) ----
    rows = B * Lp
    rt = rows if rows <= 1024 else 1024
    rows_p = _round_up(rows, rt)
    x_rows = x_p.reshape(rows, Cp)
    if rows_p != rows:
        x_rows = jnp.pad(x_rows, ((0, rows_p - rows), (0, 0)))

    sums, sumsqs = pl.pallas_call(
        _stats_kernel,
        out_shape=(jax.ShapeDtypeStruct((1, Cp), jnp.float32),
                   jax.ShapeDtypeStruct((1, Cp), jnp.float32)),
        grid_spec=pltpu.PrefetchScalarGridSpec(
            num_scalar_prefetch=0,
            grid=(rows_p // rt,),
            in_specs=[pl.BlockSpec((rt, Cp), lambda i: (i, 0))],
            out_specs=(pl.BlockSpec((1, Cp), lambda i: (0, 0)),
                       pl.BlockSpec((1, Cp), lambda i: (0, 0)))),
        compiler_params=pltpu.CompilerParams(dimension_semantics=("arbitrary",)),
    )(x_rows)

    n = float(B * L)                     # true count; zero padding does not perturb sums
    gamma_p = jnp.pad(params["gamma"].astype(jnp.float32), (0, Cp - C))
    beta_p = jnp.pad(params["beta"].astype(jnp.float32), (0, Cp - C))
    mean = sums / n                                                  # (1, Cp)
    var = jnp.maximum(sumsqs / n - mean * mean, 0.0)                 # biased variance
    scale = gamma_p[None, :] * lax.rsqrt(var + EPS)                  # (1, Cp)
    shift = beta_p[None, :] - mean * scale                           # (1, Cp)

    # ---- Conv1d(k=1) weights: pre-transpose, fold C**-0.5 into Wq/bq, cast bf16 ----
    sm = float(C) ** -0.5

    def prep_w(w, s=1.0):
        wt = w.astype(jnp.float32).T * s                             # (C_in, C_out)
        return jnp.pad(wt, ((0, Cp - C), (0, Cp - C))).astype(jnp.bfloat16)

    def prep_b(b, s=1.0):
        return jnp.pad(b.astype(jnp.float32) * s, (0, Cp - C))

    wq_t = prep_w(params["wq"], sm)
    wk_t = prep_w(params["wk"])
    wv_t = prep_w(params["wv"])
    wp_t = prep_w(params["wp"])
    biases = jnp.stack([prep_b(params["bq"], sm), prep_b(params["bk"]),
                        prep_b(params["bv"]), prep_b(params["bp"])], axis=0)   # (4, Cp)

    nq, nk = Lp // tq, Lp // tk
    est = (4 * (2 * tq + tk) * Cp * 4        # double-buffered xq/xk/out blocks (f32)
           + 4 * Cp * Cp * 2                 # four bf16 weight matrices (single copy)
           + tq * Cp * (2 + 4) + 16 * tq     # q / acc / m / l scratch
           + 8 * Cp * 4)                     # scale, shift, biases
    vmem_limit = int(min(64 * 1024 * 1024, max(32 * 1024 * 1024, 4 * est)))

    vmem = pltpu.MemorySpace.VMEM
    out_p = pl.pallas_call(
        _make_attn_kernel(tq, tk, L, Lp),
        out_shape=jax.ShapeDtypeStruct((B, Lp, Cp), jnp.float32),
        grid_spec=pltpu.PrefetchScalarGridSpec(
            num_scalar_prefetch=0,
            grid=(B, nq, nk),
            in_specs=[
                pl.BlockSpec((1, tq, Cp), lambda b, qi, ki: (b, qi, 0)),  # x (query rows)
                pl.BlockSpec((1, tk, Cp), lambda b, qi, ki: (b, ki, 0)),  # x (key/value rows)
                pl.BlockSpec(memory_space=vmem),                          # BN scale  (1, Cp)
                pl.BlockSpec(memory_space=vmem),                          # BN shift  (1, Cp)
                pl.BlockSpec(memory_space=vmem),                          # Wq^T * C^-0.5 (bf16)
                pl.BlockSpec(memory_space=vmem),                          # Wk^T (bf16)
                pl.BlockSpec(memory_space=vmem),                          # Wv^T (bf16)
                pl.BlockSpec(memory_space=vmem),                          # Wp^T (bf16)
                pl.BlockSpec(memory_space=vmem),                          # biases (4, Cp)
            ],
            out_specs=pl.BlockSpec((1, tq, Cp), lambda b, qi, ki: (b, qi, 0)),
            scratch_shapes=[
                pltpu.VMEM((tq, Cp), jnp.bfloat16),   # q tile (pre-scaled)
                pltpu.VMEM((tq, Cp), jnp.float32),    # output accumulator
                pltpu.VMEM((tq, 1), jnp.float32),     # running max
                pltpu.VMEM((tq, 1), jnp.float32),     # running denominator
            ]),
        compiler_params=pltpu.CompilerParams(
            dimension_semantics=("parallel", "parallel", "arbitrary"),
            vmem_limit_bytes=vmem_limit),
    )(x_p, x_p, scale, shift, wq_t, wk_t, wv_t, wp_t, biases)

    y = out_p[:, :L, :C]                       # drop padded rows / channels
    return jnp.transpose(y, (0, 2, 1))         # back to (B, C, L)


def init_params(key, C):
    """Deterministic parameter init mirroring the module's shapes.
    Conv1d(C, C, kernel_size=1) weight (C, C, 1) is stored squeezed as (C, C)."""
    ks = jax.random.split(key, 10)
    bound = 1.0 / (C ** 0.5)      # PyTorch Conv1d default uniform bound, fan_in = C*1
    u = lambda k, shape: jax.random.uniform(k, shape, jnp.float32, -bound, bound)
    return {
        "gamma": 1.0 + 0.1 * jax.random.normal(ks[0], (C,), jnp.float32),
        "beta": 0.1 * jax.random.normal(ks[1], (C,), jnp.float32),
        "wq": u(ks[2], (C, C)), "bq": u(ks[3], (C,)),
        "wk": u(ks[4], (C, C)), "bk": u(ks[5], (C,)),
        "wv": u(ks[6], (C, C)), "bv": u(ks[7], (C,)),
        "wp": u(ks[8], (C, C)), "bp": u(ks[9], (C,)),
    }


def _reference(x_ncl, params):
    """Pure-JAX f32 reference matching the PyTorch forward (train-mode BN)."""
    x = x_ncl.astype(jnp.float32)
    C = x.shape[1]
    mean = jnp.mean(x, axis=(0, 2))
    var = jnp.mean((x - mean[None, :, None]) ** 2, axis=(0, 2))
    h = (x - mean[None, :, None]) * lax.rsqrt(var + EPS)[None, :, None]
    h = h * params["gamma"][None, :, None] + params["beta"][None, :, None]
    q = jnp.einsum("oc,bcl->bol", params["wq"], h) + params["bq"][None, :, None]
    k = jnp.einsum("oc,bcl->bol", params["wk"], h) + params["bk"][None, :, None]
    v = jnp.einsum("oc,bcl->bol", params["wv"], h) + params["bv"][None, :, None]
    w = jnp.einsum("bci,bcj->bij", q, k) * (float(C) ** -0.5)
    w = jax.nn.softmax(w, axis=2)
    hout = jnp.einsum("bcj,bij->bci", v, w)
    proj = jnp.einsum("oc,bcl->bol", params["wp"], hout) + params["bp"][None, :, None]
    return x + proj


if __name__ == "__main__":
    # Small shapes consistent with the module; C is padded to 128 lanes inside the
    # wrapper and L=12 is padded to 16 so the key-masking path is exercised.
    B, C, L = 2, 8, 12
    key = jax.random.PRNGKey(0)
    kx, kp = jax.random.split(key)
    x = jax.random.normal(kx, (B, C, L), jnp.float32)
    params = init_params(kp, C)

    fwd = jax.jit(attn_block)
    y = fwd(x, params)
    jax.block_until_ready(y)
    assert y.shape == (B, C, L)

    y_ref = _reference(x, params)
    err = float(jnp.max(jnp.abs(y - y_ref)))
    assert err < 1e-1, f"max abs error vs reference too large: {err}"
    print("KERNEL_OK")
</pallas_src>

<mosaic_0001>
module attributes {stable_mosaic.version = 11 : i64} {
  func.func @_stats_kernel(%arg0: i32, %arg1: memref<32x128xf32, #tpu.memory_space<vmem>>, %arg2: memref<1x128xf32, #tpu.memory_space<vmem>>, %arg3: memref<1x128xf32, #tpu.memory_space<vmem>>) attributes {dimension_semantics = [#tpu.dimension_semantics<arbitrary>], iteration_bounds = array<i64: 1>, scalar_prefetch = 0 : i64, scratch_operands = 0 : i64, tpu.core_type = #tpu.core_type<tc>, window_params = [{transform_indices = @transform_0, window_bounds = array<i64: 32, 128>}, {pipeline_mode = #tpu.pipeline_mode<synchronous>, transform_indices = @transform_1, window_bounds = array<i64: 1, 128>}, {pipeline_mode = #tpu.pipeline_mode<synchronous>, transform_indices = @transform_2, window_bounds = array<i64: 1, 128>}]} {
    %c0_i32 = arith.constant 0 : i32
    %0 = arith.cmpi eq, %arg0, %c0_i32 : i32
    %1 = arith.extui %0 : i1 to i32
    %c0_i32_0 = arith.constant 0 : i32
    %2 = arith.cmpi ne, %1, %c0_i32_0 : i32
    scf.if %2 {
      %cst_11 = arith.constant 0.000000e+00 : f32
      %15 = vector.broadcast %cst_11 : f32 to vector<1x128xf32>
      %c0_12 = arith.constant 0 : index
      %c0_13 = arith.constant 0 : index
      %16 = vector.load %arg2[%c0_12, %c0_13] : memref<1x128xf32, #tpu.memory_space<vmem>>, vector<1x128xf32>
      tpu.vector_store %arg2[%c0_12, %c0_13], %15 {strides = array<i32>} : memref<1x128xf32, #tpu.memory_space<vmem>>, vector<1x128xf32>,
      %cst_14 = arith.constant 0.000000e+00 : f32
      %17 = vector.broadcast %cst_14 : f32 to vector<1x128xf32>
      %c0_15 = arith.constant 0 : index
      %c0_16 = arith.constant 0 : index
      %18 = vector.load %arg3[%c0_15, %c0_16] : memref<1x128xf32, #tpu.memory_space<vmem>>, vector<1x128xf32>
      tpu.vector_store %arg3[%c0_15, %c0_16], %17 {strides = array<i32>} : memref<1x128xf32, #tpu.memory_space<vmem>>, vector<1x128xf32>,
    } else {
    }
    %c0 = arith.constant 0 : index
    %c0_1 = arith.constant 0 : index
    %3 = vector.load %arg1[%c0, %c0_1] : memref<32x128xf32, #tpu.memory_space<vmem>>, vector<32x128xf32>
    %c0_2 = arith.constant 0 : index
    %c0_3 = arith.constant 0 : index
    %4 = vector.load %arg2[%c0_2, %c0_3] : memref<1x128xf32, #tpu.memory_space<vmem>>, vector<1x128xf32>
    %cst = arith.constant dense<0.000000e+00> : vector<128xf32>
    %5 = vector.multi_reduction <add>, %3, %cst [0] : vector<32x128xf32> to vector<128xf32>
    %6 = vector.shape_cast %5 : vector<128xf32> to vector<1x128xf32>
    %7 = arith.addf %4, %6 : vector<1x128xf32>
    %c0_4 = arith.constant 0 : index
    %c0_5 = arith.constant 0 : index
    %8 = vector.load %arg2[%c0_4, %c0_5] : memref<1x128xf32, #tpu.memory_space<vmem>>, vector<1x128xf32>
    tpu.vector_store %arg2[%c0_4, %c0_5], %7 {strides = array<i32>} : memref<1x128xf32, #tpu.memory_space<vmem>>, vector<1x128xf32>,
    %c0_6 = arith.constant 0 : index
    %c0_7 = arith.constant 0 : index
    %9 = vector.load %arg3[%c0_6, %c0_7] : memref<1x128xf32, #tpu.memory_space<vmem>>, vector<1x128xf32>
    %10 = arith.mulf %3, %3 : vector<32x128xf32>
    %cst_8 = arith.constant dense<0.000000e+00> : vector<128xf32>
    %11 = vector.multi_reduction <add>, %10, %cst_8 [0] : vector<32x128xf32> to vector<128xf32>
    %12 = vector.shape_cast %11 : vector<128xf32> to vector<1x128xf32>
    %13 = arith.addf %9, %12 : vector<1x128xf32>
    %c0_9 = arith.constant 0 : index
    %c0_10 = arith.constant 0 : index
    %14 = vector.load %arg3[%c0_9, %c0_10] : memref<1x128xf32, #tpu.memory_space<vmem>>, vector<1x128xf32>
    tpu.vector_store %arg3[%c0_9, %c0_10], %13 {strides = array<i32>} : memref<1x128xf32, #tpu.memory_space<vmem>>, vector<1x128xf32>,
    return
  }
  func.func @transform_0(%arg0: i32) -> (i32, i32) {
    %c0_i32 = arith.constant 0 : i32
    %c0_i32_0 = arith.constant 0 : i32
    return %arg0, %c0_i32 : i32, i32
  }
  func.func @transform_1(%arg0: i32) -> (i32, i32) {
    %c0_i32 = arith.constant 0 : i32
    %c0_i32_0 = arith.constant 0 : i32
    %c0_i32_1 = arith.constant 0 : i32
    return %c0_i32, %c0_i32_0 : i32, i32
  }
  func.func @transform_2(%arg0: i32) -> (i32, i32) {
    %c0_i32 = arith.constant 0 : i32
    %c0_i32_0 = arith.constant 0 : i32
    %c0_i32_1 = arith.constant 0 : i32
    return %c0_i32, %c0_i32_0 : i32, i32
  }
}

module attributes {stable_mosaic.version = 11 : i64} {
  func.func @kernel(%arg0: i32, %arg1: i32, %arg2: i32, %arg3: memref<1x16x128xf32, #tpu.memory_space<vmem>>, %arg4: memref<1x16x128xf32, #tpu.memory_space<vmem>>, %arg5: memref<1x128xf32, #tpu.memory_space<vmem>>, %arg6: memref<1x128xf32, #tpu.memory_space<vmem>>, %arg7: memref<128x128xbf16, #tpu.memory_space<vmem>>, %arg8: memref<128x128xbf16, #tpu.memory_space<vmem>>, %arg9: memref<128x128xbf16, #tpu.memory_space<vmem>>, %arg10: memref<128x128xbf16, #tpu.memory_space<vmem>>, %arg11: memref<4x128xf32, #tpu.memory_space<vmem>>, %arg12: memref<1x16x128xf32, #tpu.memory_space<vmem>>, %arg13: memref<16x128xbf16, #tpu.memory_space<vmem>>, %arg14: memref<16x128xf32, #tpu.memory_space<vmem>>, %arg15: memref<16x1xf32, #tpu.memory_space<vmem>>, %arg16: memref<16x1xf32, #tpu.memory_space<vmem>>) attributes {dimension_semantics = [#tpu.dimension_semantics<parallel>, #tpu.dimension_semantics<parallel>, #tpu.dimension_semantics<arbitrary>], iteration_bounds = array<i64: 2, 1, 1>, scalar_prefetch = 0 : i64, scratch_operands = 4 : i64, tpu.core_type = #tpu.core_type<tc>, window_params = [{transform_indices = @transform_0, window_bounds = array<i64: 1, 16, 128>}, {transform_indices = @transform_1, window_bounds = array<i64: 1, 16, 128>}, {pipeline_mode = #tpu.pipeline_mode<synchronous>, transform_indices = @transform_2, window_bounds = array<i64: 1, 128>}, {pipeline_mode = #tpu.pipeline_mode<synchronous>, transform_indices = @transform_3, window_bounds = array<i64: 1, 128>}, {pipeline_mode = #tpu.pipeline_mode<synchronous>, transform_indices = @transform_4, window_bounds = array<i64: 128, 128>}, {pipeline_mode = #tpu.pipeline_mode<synchronous>, transform_indices = @transform_5, window_bounds = array<i64: 128, 128>}, {pipeline_mode = #tpu.pipeline_mode<synchronous>, transform_indices = @transform_6, window_bounds = array<i64: 128, 128>}, {pipeline_mode = #tpu.pipeline_mode<synchronous>, transform_indices = @transform_7, window_bounds = array<i64: 128, 128>}, {pipeline_mode = #tpu.pipeline_mode<synchronous>, transform_indices = @transform_8, window_bounds = array<i64: 4, 128>}, {transform_indices = @transform_9, window_bounds = array<i64: 1, 16, 128>}]} {
    %c0 = arith.constant 0 : index
    %c0_0 = arith.constant 0 : index
    %0 = vector.load %arg5[%c0, %c0_0] : memref<1x128xf32, #tpu.memory_space<vmem>>, vector<1x128xf32>
    %c0_1 = arith.constant 0 : index
    %c0_2 = arith.constant 0 : index
    %1 = vector.load %arg6[%c0_1, %c0_2] : memref<1x128xf32, #tpu.memory_space<vmem>>, vector<1x128xf32>
    %c0_3 = arith.constant 0 : index
    %c0_4 = arith.constant 0 : index
    %2 = vector.load %arg11[%c0_3, %c0_4] : memref<4x128xf32, #tpu.memory_space<vmem>>, vector<4x128xf32>
    %c0_i32 = arith.constant 0 : i32
    %3 = arith.cmpi eq, %arg2, %c0_i32 : i32
    %4 = arith.extui %3 : i1 to i32
    %c0_i32_5 = arith.constant 0 : i32
    %5 = arith.cmpi ne, %4, %c0_i32_5 : i32
    scf.if %5 {
      %c0_35 = arith.constant 0 : index
      %c0_36 = arith.constant 0 : index
      %c0_37 = arith.constant 0 : index
      %61 = vector.load %arg3[%c0_35, %c0_36, %c0_37] : memref<1x16x128xf32, #tpu.memory_space<vmem>>, vector<1x16x128xf32>
      %62 = vector.shape_cast %61 : vector<1x16x128xf32> to vector<16x128xf32>
      %63 = vector.broadcast %0 : vector<1x128xf32> to vector<16x128xf32>
      %64 = arith.mulf %62, %63 : vector<16x128xf32>
      %65 = vector.broadcast %1 : vector<1x128xf32> to vector<16x128xf32>
      %66 = arith.addf %64, %65 : vector<16x128xf32>
      %67 = arith.truncf %66 : vector<16x128xf32> to vector<16x128xbf16>
      %c0_38 = arith.constant 0 : index
      %c0_39 = arith.constant 0 : index
      %68 = vector.load %arg7[%c0_38, %c0_39] : memref<128x128xbf16, #tpu.memory_space<vmem>>, vector<128x128xbf16>
      %cst_40 = arith.constant dense<0.000000e+00> : vector<16x128xf32>
      %69 = tpu.matmul %67, %68, %cst_40 {dimension_numbers = #tpu.dot_dimension_numbers<[1], [0], [0], [1], [0, 0, 1, 1], [], []>} : vector<16x128xbf16>, vector<128x128xbf16>, vector<16x128xf32> -> vector<16x128xf32>
      %70 = vector.extract_strided_slice %2 {offsets = [0, 0], sizes = [1, 128], strides = [1, 1]} : vector<4x128xf32> to vector<1x128xf32>
      %71 = vector.broadcast %70 : vector<1x128xf32> to vector<16x128xf32>
      %72 = arith.addf %69, %71 : vector<16x128xf32>
      %73 = arith.truncf %72 : vector<16x128xf32> to vector<16x128xbf16>
      %c0_41 = arith.constant 0 : index
      %c0_42 = arith.constant 0 : index
      %74 = vector.load %arg13[%c0_41, %c0_42] : memref<16x128xbf16, #tpu.memory_space<vmem>>, vector<16x128xbf16>
      tpu.vector_store %arg13[%c0_41, %c0_42], %73 {strides = array<i32>} : memref<16x128xbf16, #tpu.memory_space<vmem>>, vector<16x128xbf16>,
      %cst_43 = arith.constant 0.000000e+00 : f32
      %75 = vector.broadcast %cst_43 : f32 to vector<16x128xf32>
      %c0_44 = arith.constant 0 : index
      %c0_45 = arith.constant 0 : index
      %76 = vector.load %arg14[%c0_44, %c0_45] : memref<16x128xf32, #tpu.memory_space<vmem>>, vector<16x128xf32>
      tpu.vector_store %arg14[%c0_44, %c0_45], %75 {strides = array<i32>} : memref<16x128xf32, #tpu.memory_space<vmem>>, vector<16x128xf32>,
      %cst_46 = arith.constant 0xFF800000 : f32
      %77 = vector.broadcast %cst_46 : f32 to vector<16x1xf32>
      %c0_47 = arith.constant 0 : index
      %c0_48 = arith.constant 0 : index
      %78 = vector.load %arg15[%c0_47, %c0_48] : memref<16x1xf32, #tpu.memory_space<vmem>>, vector<16x1xf32>
      tpu.vector_store %arg15[%c0_47, %c0_48], %77 {strides = array<i32>} : memref<16x1xf32, #tpu.memory_space<vmem>>, vector<16x1xf32>,
      %cst_49 = arith.constant 0.000000e+00 : f32
      %79 = vector.broadcast %cst_49 : f32 to vector<16x1xf32>
      %c0_50 = arith.constant 0 : index
      %c0_51 = arith.constant 0 : index
      %80 = vector.load %arg16[%c0_50, %c0_51] : memref<16x1xf32, #tpu.memory_space<vmem>>, vector<16x1xf32>
      tpu.vector_store %arg16[%c0_50, %c0_51], %79 {strides = array<i32>} : memref<16x1xf32, #tpu.memory_space<vmem>>, vector<16x1xf32>,
    } else {
    }
    %c0_6 = arith.constant 0 : index
    %c0_7 = arith.constant 0 : index
    %c0_8 = arith.constant 0 : index
    %6 = vector.load %arg4[%c0_6, %c0_7, %c0_8] : memref<1x16x128xf32, #tpu.memory_space<vmem>>, vector<1x16x128xf32>
    %7 = vector.shape_cast %6 : vector<1x16x128xf32> to vector<16x128xf32>
    %8 = vector.broadcast %0 : vector<1x128xf32> to vector<16x128xf32>
    %9 = arith.mulf %7, %8 : vector<16x128xf32>
    %10 = vector.broadcast %1 : vector<1x128xf32> to vector<16x128xf32>
    %11 = arith.addf %9, %10 : vector<16x128xf32>
    %12 = arith.truncf %11 : vector<16x128xf32> to vector<16x128xbf16>
    %c0_9 = arith.constant 0 : index
    %c0_10 = arith.constant 0 : index
    %13 = vector.load %arg8[%c0_9, %c0_10] : memref<128x128xbf16, #tpu.memory_space<vmem>>, vector<128x128xbf16>
    %cst = arith.constant dense<0.000000e+00> : vector<16x128xf32>
    %14 = tpu.matmul %12, %13, %cst {dimension_numbers = #tpu.dot_dimension_numbers<[1], [0], [0], [1], [0, 0, 1, 1], [], []>} : vector<16x128xbf16>, vector<128x128xbf16>, vector<16x128xf32> -> vector<16x128xf32>
    %15 = vector.extract_strided_slice %2 {offsets = [1, 0], sizes = [1, 128], strides = [1, 1]} : vector<4x128xf32> to vector<1x128xf32>
    %16 = vector.broadcast %15 : vector<1x128xf32> to vector<16x128xf32>
    %17 = arith.addf %14, %16 : vector<16x128xf32>
    %18 = arith.truncf %17 : vector<16x128xf32> to vector<16x128xbf16>
    %c0_11 = arith.constant 0 : index
    %c0_12 = arith.constant 0 : index
    %19 = vector.load %arg9[%c0_11, %c0_12] : memref<128x128xbf16, #tpu.memory_space<vmem>>, vector<128x128xbf16>
    %cst_13 = arith.constant dense<0.000000e+00> : vector<16x128xf32>
    %20 = tpu.matmul %12, %19, %cst_13 {dimension_numbers = #tpu.dot_dimension_numbers<[1], [0], [0], [1], [0, 0, 1, 1], [], []>} : vector<16x128xbf16>, vector<128x128xbf16>, vector<16x128xf32> -> vector<16x128xf32>
    %21 = vector.extract_strided_slice %2 {offsets = [2, 0], sizes = [1, 128], strides = [1, 1]} : vector<4x128xf32> to vector<1x128xf32>
    %22 = vector.broadcast %21 : vector<1x128xf32> to vector<16x128xf32>
    %23 = arith.addf %20, %22 : vector<16x128xf32>
    %24 = arith.truncf %23 : vector<16x128xf32> to vector<16x128xbf16>
    %c0_14 = arith.constant 0 : index
    %c0_15 = arith.constant 0 : index
    %25 = vector.load %arg13[%c0_14, %c0_15] : memref<16x128xbf16, #tpu.memory_space<vmem>>, vector<16x128xbf16>
    %cst_16 = arith.constant dense<0.000000e+00> : vector<16x16xf32>
    %26 = tpu.matmul %25, %18, %cst_16 {dimension_numbers = #tpu.dot_dimension_numbers<[1], [1], [0], [0], [0, 0, 1, 0], [], []>} : vector<16x128xbf16>, vector<16x128xbf16>, vector<16x16xf32> -> vector<16x16xf32>
    %c16_i32 = arith.constant 16 : i32
    %27 = arith.muli %arg2, %c16_i32 : i32
    %28 = tpu.iota {dimensions = array<i32: 1>} : vector<16x16xi32>
    %29 = vector.broadcast %27 : i32 to vector<16x16xi32>
    %30 = arith.addi %29, %28 : vector<16x16xi32>
    %c12_i32 = arith.constant 12 : i32
    %31 = vector.broadcast %c12_i32 : i32 to vector<16x16xi32>
    %32 = arith.cmpi slt, %30, %31 : vector<16x16xi32>
    %cst_17 = arith.constant 0xFF800000 : f32
    %33 = vector.broadcast %cst_17 : f32 to vector<16x16xf32>
    %34 = arith.select %32, %26, %33 : vector<16x16xi1>, vector<16x16xf32>
    %c0_18 = arith.constant 0 : index
    %c0_19 = arith.constant 0 : index
    %35 = vector.load %arg15[%c0_18, %c0_19] : memref<16x1xf32, #tpu.memory_space<vmem>>, vector<16x1xf32>
    %cst_20 = arith.constant dense<0xFF800000> : vector<16xf32>
    %36 = vector.multi_reduction <maximumf>, %34, %cst_20 [1] : vector<16x16xf32> to vector<16xf32>
    %37 = vector.shape_cast %36 : vector<16xf32> to vector<16x1xf32>
    %38 = arith.maximumf %35, %37 : vector<16x1xf32>
    %39 = arith.subf %35, %38 : vector<16x1xf32>
    %40 = math.exp %39 : vector<16x1xf32>
    %41 = vector.broadcast %38 : vector<16x1xf32> to vector<16x16xf32>
    %42 = arith.subf %34, %41 : vector<16x16xf32>
    %43 = math.exp %42 : vector<16x16xf32>
    %c0_21 = arith.constant 0 : index
    %c0_22 = arith.constant 0 : index
    %44 = vector.load %arg16[%c0_21, %c0_22] : memref<16x1xf32, #tpu.memory_space<vmem>>, vector<16x1xf32>
    %45 = arith.mulf %40, %44 : vector<16x1xf32>
    %cst_23 = arith.constant dense<0.000000e+00> : vector<16xf32>
    %46 = vector.multi_reduction <add>, %43, %cst_23 [1] : vector<16x16xf32> to vector<16xf32>
    %47 = vector.shape_cast %46 : vector<16xf32> to vector<16x1xf32>
    %48 = arith.addf %45, %47 : vector<16x1xf32>
    %c0_24 = arith.constant 0 : index
    %c0_25 = arith.constant 0 : index
    %49 = vector.load %arg16[%c0_24, %c0_25] : memref<16x1xf32, #tpu.memory_space<vmem>>, vector<16x1xf32>
    tpu.vector_store %arg16[%c0_24, %c0_25], %48 {strides = array<i32>} : memref<16x1xf32, #tpu.memory_space<vmem>>, vector<16x1xf32>,
    %c0_26 = arith.constant 0 : index
    %c0_27 = arith.constant 0 : index
    %50 = vector.load %arg14[%c0_26, %c0_27] : memref<16x128xf32, #tpu.memory_space<vmem>>, vector<16x128xf32>
    %51 = vector.broadcast %40 : vector<16x1xf32> to vector<16x128xf32>
    %52 = arith.mulf %51, %50 : vector<16x128xf32>
    %53 = arith.truncf %43 : vector<16x16xf32> to vector<16x16xbf16>
    %cst_28 = arith.constant dense<0.000000e+00> : vector<16x128xf32>
    %54 = tpu.matmul %53, %24, %cst_28 {dimension_numbers = #tpu.dot_dimension_numbers<[1], [0], [0], [1], [0, 0, 1, 1], [], []>} : vector<16x16xbf16>, vector<16x128xbf16>, vector<16x128xf32> -> vector<16x128xf32>
    %55 = arith.addf %52, %54 : vector<16x128xf32>
    %c0_29 = arith.constant 0 : index
    %c0_30 = arith.constant 0 : index
    %56 = vector.load %arg14[%c0_29, %c0_30] : memref<16x128xf32, #tpu.memory_space<vmem>>, vector<16x128xf32>
    tpu.vector_store %arg14[%c0_29, %c0_30], %55 {strides = array<i32>} : memref<16x128xf32, #tpu.memory_space<vmem>>, vector<16x128xf32>,
    %c0_31 = arith.constant 0 : index
    %c0_32 = arith.constant 0 : index
    %57 = vector.load %arg15[%c0_31, %c0_32] : memref<16x1xf32, #tpu.memory_space<vmem>>, vector<16x1xf32>
    tpu.vector_store %arg15[%c0_31, %c0_32], %38 {strides = array<i32>} : memref<16x1xf32, #tpu.memory_space<vmem>>, vector<16x1xf32>,
    %c0_i32_33 = arith.constant 0 : i32
    %58 = arith.cmpi eq, %arg2, %c0_i32_33 : i32
    %59 = arith.extui %58 : i1 to i32
    %c0_i32_34 = arith.constant 0 : i32
    %60 = arith.cmpi ne, %59, %c0_i32_34 : i32
    scf.if %60 {
      %c0_35 = arith.constant 0 : index
      %c0_36 = arith.constant 0 : index
      %61 = vector.load %arg14[%c0_35, %c0_36] : memref<16x128xf32, #tpu.memory_space<vmem>>, vector<16x128xf32>
      %c0_37 = arith.constant 0 : index
      %c0_38 = arith.constant 0 : index
      %62 = vector.load %arg16[%c0_37, %c0_38] : memref<16x1xf32, #tpu.memory_space<vmem>>, vector<16x1xf32>
      %63 = tpu.reciprocal %62 {approx = true} : vector<16x1xf32> -> vector<16x1xf32>
      %64 = vector.broadcast %63 : vector<16x1xf32> to vector<16x128xf32>
      %65 = arith.mulf %61, %64 : vector<16x128xf32>
      %66 = arith.truncf %65 : vector<16x128xf32> to vector<16x128xbf16>
      %c0_39 = arith.constant 0 : index
      %c0_40 = arith.constant 0 : index
      %67 = vector.load %arg10[%c0_39, %c0_40] : memref<128x128xbf16, #tpu.memory_space<vmem>>, vector<128x128xbf16>
      %cst_41 = arith.constant dense<0.000000e+00> : vector<16x128xf32>
      %68 = tpu.matmul %66, %67, %cst_41 {dimension_numbers = #tpu.dot_dimension_numbers<[1], [0], [0], [1], [0, 0, 1, 1], [], []>} : vector<16x128xbf16>, vector<128x128xbf16>, vector<16x128xf32> -> vector<16x128xf32>
      %69 = vector.extract_strided_slice %2 {offsets = [3, 0], sizes = [1, 128], strides = [1, 1]} : vector<4x128xf32> to vector<1x128xf32>
      %70 = vector.broadcast %69 : vector<1x128xf32> to vector<16x128xf32>
      %71 = arith.addf %68, %70 : vector<16x128xf32>
      %c0_42 = arith.constant 0 : index
      %c0_43 = arith.constant 0 : index
      %c0_44 = arith.constant 0 : index
      %72 = vector.load %arg3[%c0_42, %c0_43, %c0_44] : memref<1x16x128xf32, #tpu.memory_space<vmem>>, vector<1x16x128xf32>
      %73 = vector.shape_cast %72 : vector<1x16x128xf32> to vector<16x128xf32>
      %74 = arith.addf %73, %71 : vector<16x128xf32>
      %c0_45 = arith.constant 0 : index
      %c0_46 = arith.constant 0 : index
      %c0_47 = arith.constant 0 : index
      %75 = vector.load %arg12[%c0_45, %c0_46, %c0_47] : memref<1x16x128xf32, #tpu.memory_space<vmem>>, vector<1x16x128xf32>
      %76 = vector.shape_cast %75 : vector<1x16x128xf32> to vector<16x128xf32>
      %77 = vector.shape_cast %74 : vector<16x128xf32> to vector<1x16x128xf32>
      tpu.vector_store %arg12[%c0_45, %c0_46, %c0_47], %77 {strides = array<i32>} : memref<1x16x128xf32, #tpu.memory_space<vmem>>, vector<1x16x128xf32>,
    } else {
    }
    return
  }
  func.func @transform_0(%arg0: i32, %arg1: i32, %arg2: i32) -> (i32, i32, i32) {
    %c0_i32 = arith.constant 0 : i32
    %c0_i32_0 = arith.constant 0 : i32
    return %arg0, %arg1, %c0_i32 : i32, i32, i32
  }
  func.func @transform_1(%arg0: i32, %arg1: i32, %arg2: i32) -> (i32, i32, i32) {
    %c0_i32 = arith.constant 0 : i32
    %c0_i32_0 = arith.constant 0 : i32
    return %arg0, %arg2, %c0_i32 : i32, i32, i32
  }
  func.func @transform_2(%arg0: i32, %arg1: i32, %arg2: i32) -> (i32, i32) {
    %c0_i32 = arith.constant 0 : i32
    %c0_i32_0 = arith.constant 0 : i32
    %c0_i32_1 = arith.constant 0 : i32
    return %c0_i32, %c0_i32_0 : i32, i32
  }
  func.func @transform_3(%arg0: i32, %arg1: i32, %arg2: i32) -> (i32, i32) {
    %c0_i32 = arith.constant 0 : i32
    %c0_i32_0 = arith.constant 0 : i32
    %c0_i32_1 = arith.constant 0 : i32
    return %c0_i32, %c0_i32_0 : i32, i32
  }
  func.func @transform_4(%arg0: i32, %arg1: i32, %arg2: i32) -> (i32, i32) {
    %c0_i32 = arith.constant 0 : i32
    %c0_i32_0 = arith.constant 0 : i32
    %c0_i32_1 = arith.constant 0 : i32
    return %c0_i32, %c0_i32_0 : i32, i32
  }
  func.func @transform_5(%arg0: i32, %arg1: i32, %arg2: i32) -> (i32, i32) {
    %c0_i32 = arith.constant 0 : i32
    %c0_i32_0 = arith.constant 0 : i32
    %c0_i32_1 = arith.constant 0 : i32
    return %c0_i32, %c0_i32_0 : i32, i32
  }
  func.func @transform_6(%arg0: i32, %arg1: i32, %arg2: i32) -> (i32, i32) {
    %c0_i32 = arith.constant 0 : i32
    %c0_i32_0 = arith.constant 0 : i32
    %c0_i32_1 = arith.constant 0 : i32
    return %c0_i32, %c0_i32_0 : i32, i32
  }
  func.func @transform_7(%arg0: i32, %arg1: i32, %arg2: i32) -> (i32, i32) {
    %c0_i32 = arith.constant 0 : i32
    %c0_i32_0 = arith.constant 0 : i32
    %c0_i32_1 = arith.constant 0 : i32
    return %c0_i32, %c0_i32_0 : i32, i32
  }
  func.func @transform_8(%arg0: i32, %arg1: i32, %arg2: i32) -> (i32, i32) {
    %c0_i32 = arith.constant 0 : i32
    %c0_i32_0 = arith.constant 0 : i32
    %c0_i32_1 = arith.constant 0 : i32
    return %c0_i32, %c0_i32_0 : i32, i32
  }
  func.func @transform_9(%arg0: i32, %arg1: i32, %arg2: i32) -> (i32, i32, i32) {
    %c0_i32 = arith.constant 0 : i32
    %c0_i32_0 = arith.constant 0 : i32
    return %arg0, %arg1, %c0_i32 : i32, i32, i32
  }
}

</mosaic_0001>

<bundles_post_ra>
// kernel: attn_block.2
= control target key start
LH: loop header
LB: loop body
LE: loop exit
PB: predicated region body
PF: predicated region fallthrough
CT: control target
= control target key end

     0   :  { %v57_v0 = vmov 0.0   ;;  %s103_s1 = inlined_call_operand.vmem [shape: f32[1,128], index: 1, kind: output, shape index: {0}]   ;;  %s104_s2 = inlined_call_operand.vmem [shape: f32[1,128], index: 2, kind: output, shape index: {1}]   ;;  %s105_s0 = inlined_call_operand.vmem [shape: f32[32,128], index: 0, kind: input, shape index: {}]  }
   0x1   :  { %14 = vst [vmem:[%s103_s1] sm:$0x1] %v57_v0  ;;  %v16_v1 = vld [vmem:[%s105_s0] sm:$0xff]  ;;  %v17_v2 = vld [vmem:[%s105_s0 + $0x8] sm:$0xff]  ;;  %v18_v3 = vld [vmem:[%s105_s0 + $0x10] sm:$0xff] }
   0x2   :  { %15 = vst [vmem:[%s104_s2] sm:$0x1] %v57_v0  ;;  %v19_v4 = vld [vmem:[%s105_s0 + $0x18] sm:$0xff]  ;;  %v21_v5 = vadd.f32 %v17_v2, %v16_v1  ;;  %v33_v6 = vmul.f32 %v16_v1, %v16_v1  ;;  %v34_v7 = vmul.f32 %v17_v2, %v17_v2  ;;  %v35_v8 = vmul.f32 %v18_v3, %v18_v3 }
   0x3   :  { %v36_v10 = vmul.f32 %v19_v4, %v19_v4 }
   0x4   :  { %v22_v9 = vadd.f32 %v21_v5, %v18_v3  ;;  %v37_v11 = vadd.f32 %v34_v7, %v33_v6 }
   0x6   :  { %v23_v12 = vadd.f32 %v22_v9, %v19_v4  ;;  %v38_v13 = vadd.f32 %v37_v11, %v35_v8 }
   0x8   :  { %v24_v14 = vrot.slane %v23_v12, 4  ;;  %v39_v15 = vadd.f32 %v38_v13, %v36_v10  ;;  %v20_v24 = vld [vmem:[%s103_s1] sm:$0x1] }
   0x9   :  { %v32_v27 = vld [vmem:[%s104_s2] sm:$0x1] }
   0xa   :  { %v25_v16 = vadd.f32 %v24_v14, %v23_v12  ;;  %v40_v17 = vrot.slane %v39_v15, 4 }
   0xc   :  { %v26_v18 = vrot.slane %v25_v16, 2  ;;  %v41_v19 = vadd.f32 %v40_v17, %v39_v15 }
   0xe   :  { %v27_v20 = vadd.f32 %v26_v18, %v25_v16  ;;  %v42_v21 = vrot.slane %v41_v19, 2 }
  0x10   :  { %v28_v22 = vrot.slane %v27_v20, 1  ;;  %v43_v23 = vadd.f32 %v42_v21, %v41_v19 }
  0x12   :  { %v29_v25 = vadd.f32 %v28_v22, %v27_v20  ;;  %v44_v26 = vrot.slane %v43_v23, 1 }
  0x14   :  { %v30_v28 = vadd.f32 %v29_v25, %v20_v24  ;;  %v45_v29 = vadd.f32 %v44_v26, %v43_v23 }
  0x16   :  { %31 = vst [vmem:[%s103_s1] sm:$0x1] %v30_v28  ;;  %v46_v30 = vadd.f32 %v45_v29, %v32_v27 }
  0x18   :  { %47 = vst [vmem:[%s104_s2] sm:$0x1] %v46_v30 }

// kernel: attn_block.3
= control target key start
LH: loop header
LB: loop body
LE: loop exit
PB: predicated region body
PF: predicated region fallthrough
CT: control target
= control target key end

     0   :  { %s1338_s30 = smov 0   ;;  %s1340_s10 = smov 0   ;;  %s1511_s0 = inlined_call_operand.vmem [shape: f32[2,16,128], index: 0, kind: input, shape index: {}, may-alias: {0,1}]   ;;  %s1512_s1 = inlined_call_operand.vmem [shape: f32[2,16,128], index: 1, kind: input, shape index: {}, may-alias: {0,1}]   ;;  %s1513_s2 = inlined_call_operand.vmem [shape: f32[1,128], index: 2, kind: input, shape index: {}]   ;;  %s1514_s3 = inlined_call_operand.vmem [shape: f32[1,128], index: 3, kind: input, shape index: {}]   ;;  %s1515_s4 = inlined_call_operand.vmem [shape: bf16[128,128], index: 4, kind: input, shape index: {}]   ;;  %s1516_s5 = inlined_call_operand.vmem [shape: bf16[128,128], index: 5, kind: input, shape index: {}]   ;;  %s1517_s6 = inlined_call_operand.vmem [shape: bf16[128,128], index: 6, kind: input, shape index: {}]   ;;  %s1518_s7 = inlined_call_operand.vmem [shape: bf16[128,128], index: 7, kind: input, shape index: {}]   ;;  %s1519_s8 = inlined_call_operand.vmem [shape: f32[4,128], index: 8, kind: input, shape index: {}]   ;;  %s1520_s9 = inlined_call_operand.vmem [shape: f32[2,16,128], index: 9, kind: output, shape index: {}]  }
   0x1   :  { %s1342_s11 = smov 0  }
   0x2 LB: > { %s38_s12 = sadd.s32 1, %s1279_s10  ;;  %p1034_p0 = scmp.ge.s32.totalorder %s1283_s11, 1  ;;  %s1283_s11 = sphi %s1342_s11, %s19_s11   ;;  %s1279_s10 = sphi %s1340_s10, %s1522_s10   ;;  %s1275_s30 = sphi %s1338_s30, %s1521_s30  }
   0x3   : > { %p40_p1 = scmp.ge.s32.totalorder %s38_s12, 2  ;;  %p332_p2 = scmp.lt.s32.totalorder %s1283_s11, 3 }
   0x5   : > { %s1524_s12 = smov (%p40_p1, %s38_s12), 0  ;;  %p333_p3 = pnand %p1034_p0, %p332_p2 }
   0x6   : > { %p386_p4 = scmp.lt.s32.totalorder (!%p333_p3), %s1275_s30, 1 }
   0x7   : > { %336 = sbr.rel (%p333_p3) target bundleno = 968 (0x3c8), region = 56 }
   0xc   : > { %v1186_v0 = vld [vmem:[%s1515_s4 + $0x38] sm:$0xff]  ;;  %v1185_v2 = vld [vmem:[%s1515_s4 + $0x30] sm:$0xff]  ;;  %v1184_v4 = vld [vmem:[%s1515_s4 + $0x28] sm:$0xff]  ;;  %s1526_s30 = smov (!%p386_p4, %s1275_s30), 1  ;;  %vm521_vm0 = vcmask 7168   ;;  %v1285_v48 = vmov -inf   ;;  %v722_v51 = vlaneseq }
   0xd   : > { %v1194_v1 = vld [vmem:[%s1516_s5 + $0x38] sm:$0xff]  ;;  %501 = vmatpush.bf16.msra.mxu0 %v1186_v0  ;;  %v1193_v3 = vld [vmem:[%s1516_s5 + $0x30] sm:$0xff]  ;;  %v1192_v5 = vld [vmem:[%s1516_s5 + $0x28] sm:$0xff]  ;;  %s1380_s29 = sshll.u32 %s1526_s30, 4  ;;  %522 = vst.msk [vmem:[#allocation4] sm:$0xff] %vm521_vm0, %v1285_v48  ;;  %vm731_vm2 = vcmask 130048  }
   0xe   : > { %604 = vmatpush.bf16.msra.mxu1 %v1194_v1  ;;  %v1183_v6 = vld [vmem:[%s1515_s4 + $0x20] sm:$0xff]  ;;  %v1182_v8 = vld [vmem:[%s1515_s4 + $0x18] sm:$0xff]  ;;  %s393_s19 = scalar_lea.vmem %s1511_s0, %s1380_s29  ;;  %s403_s30 = scalar_lea.vmem %s1512_s1, %s1380_s29  ;;  %v1181_v10 = vld [vmem:[%s1515_s4 + $0x10] sm:$0xff]  ;;  %523 = vst.msk [vmem:[#allocation4 + $0x8] sm:$0xff] %vm521_vm0, %v1285_v48  ;;  %v723_v53 = vand.u32 127, %v722_v51  ;;  %v1286_v63 = vmov 0  }
   0xf   : > { %v1191_v7 = vld [vmem:[%s1516_s5 + $0x20] sm:$0xff]  ;;  %v1190_v9 = vld [vmem:[%s1516_s5 + $0x18] sm:$0xff]  ;;  %v1189_v11 = vld [vmem:[%s1516_s5 + $0x10] sm:$0xff]  ;;  %1244 = vset.pattern.permute.xlu1 %v1286_v63  ;;  %1245 = vset.pattern.permute.xlu0 %v1286_v63  ;;  %v1287_v0 = vmov 0.0   ;;  %s413_s23 = scalar_lea.vmem %s1520_s9, %s1380_s29 }
  0x10   : > { %v1402_v12 = vld [vmem:[%s393_s19] sm:$0xff]  ;;  %v1407_v14 = vld [vmem:[%s393_s19 + $0x8] sm:$0xff]  ;;  %v1202_v46 = vld [vmem:[%s1517_s6 + $0x38] sm:$0xff]  ;;  %vm726_vm1 = vcmp.lt.s32.totalorder %v723_v53, 12  ;;  %1246 = vset.pattern.permute.xlu2 %v1286_v63  ;;  %524 = vst.msk [vmem:[#allocation5] sm:$0xff] %vm521_vm0, %v1287_v0 }
  0x11   : > { %502 = vmatpush.bf16.msra.mxu0 %v1185_v2  ;;  %v1247_v13 = vld [vmem:[%s1513_s2] ss:$0 sm:$0xff]  ;;  %v527_v16 = vld [vmem:[%s403_s30 + $0x8] sm:$0xff]  ;;  %684 = vmatpush.bf16.msra.mxu2 %v1202_v46  ;;  %v1201_v47 = vld [vmem:[%s1517_s6 + $0x30] sm:$0xff]  ;;  %525 = vst.msk [vmem:[#allocation5 + $0x8] sm:$0xff] %vm521_vm0, %v1287_v0 }
  0x12   : > { %605 = vmatpush.bf16.msra.mxu1 %v1193_v3  ;;  %v526_v15 = vld [vmem:[%s403_s30] sm:$0xff]  ;;  %v428_v17 = vmul.f32 %v1247_v13, %v1402_v12  ;;  %v429_v18 = vmul.f32 %v1247_v13, %v1407_v14  ;;  %v532_v21 = vmul.f32 %v1247_v13, %v527_v16  ;;  %v1180_v22 = vld [vmem:[%s1515_s4 + $0x8] sm:$0xff]  ;;  %v1198_v52 = vld [vmem:[%s1517_s6 + $0x18] sm:$0xff] }
  0x13   : > { %v1248_v19 = vld [vmem:[%s1514_s3] ss:$0 sm:$0xff]  ;;  %v531_v20 = vmul.f32 %v1247_v13, %v526_v15  ;;  %v1188_v23 = vld [vmem:[%s1516_s5 + $0x8] sm:$0xff]  ;;  %v1197_v54 = vld [vmem:[%s1517_s6 + $0x10] sm:$0xff] }
  0x14   : > { %v433_v24 = vadd.f32 %v1248_v19, %v428_v17  ;;  %v434_v25 = vadd.f32 %v1248_v19, %v429_v18  ;;  %v537_v27 = vadd.f32 %v1248_v19, %v532_v21  ;;  %v1179_v28 = vld [vmem:[%s1515_s4] sm:$0xff]  ;;  %v1200_v49 = vld [vmem:[%s1517_s6 + $0x28] sm:$0xff]  ;;  %v1210_v46 = vld [vmem:[%s1518_s7 + $0x30] sm:$0xff] }
  0x15   : > { %503 = vmatpush.bf16.msra.mxu0 %v1184_v4  ;;  %v536_v26 = vadd.f32 %v1248_v19, %v531_v20  ;;  %v1187_v29 = vld [vmem:[%s1516_s5] sm:$0xff]  ;;  %685 = vmatpush.bf16.msra.mxu2 %v1201_v47  ;;  %v1196_v57 = vld [vmem:[%s1517_s6 + $0x8] sm:$0xff] }
  0x16   : > { %606 = vmatpush.bf16.msra.mxu1 %v1192_v5  ;;  %v435_v30 = vpack.c.bf16 %v434_v25, %v433_v24  ;;  %v1429_v34 = vld [vmem:[%s1519_s8] sm:$0xf]  ;;  %v729_v1 = vld [vmem:[#allocation4] sm:$0xff] }
  0x17   : > { %v538_v31 = vpack.c.bf16 %v537_v27, %v536_v26  ;;  %v452_v35 = vperm.slane %v1429_v34, 0  ;;  %v555_v36 = vperm.slane %v1429_v34, 1  ;;  %v1199_v50 = vld [vmem:[%s1517_s6 + $0x20] sm:$0xff]  ;;  %v635_v16 = vperm.slane %v1429_v34, 2  ;;  %v1209_v47 = vld [vmem:[%s1518_s7 + $0x28] sm:$0xff] }
  0x18   : > { %v1195_v59 = vld [vmem:[%s1517_s6] sm:$0xff]  ;;  %v1205_v51 = vld [vmem:[%s1518_s7 + $0x8] sm:$0xff] }
  0x19   : > { %504 = vmatpush.bf16.msra.mxu0 %v1183_v6  ;;  %686 = vmatpush.bf16.msra.mxu2 %v1200_v49  ;;  %v730_v6 = vld [vmem:[#allocation4 + $0x8] sm:$0xff]  ;;  %v1208_v48 = vld [vmem:[%s1518_s7 + $0x20] sm:$0xff]  ;;  %v1207_v49 = vld [vmem:[%s1518_s7 + $0x18] sm:$0xff] }
  0x1a   : > { %607 = vmatpush.bf16.msra.mxu1 %v1191_v7 }
  0x1d   : > { %505 = vmatpush.bf16.msra.mxu0 %v1182_v8  ;;  %687 = vmatpush.bf16.msra.mxu2 %v1199_v50  ;;  %v1206_v50 = vld [vmem:[%s1518_s7 + $0x10] sm:$0xff] }
  0x1e   : > { %608 = vmatpush.bf16.msra.mxu1 %v1190_v9 }
  0x21   : > { %506 = vmatpush.bf16.msra.mxu0 %v1181_v10  ;;  %688 = vmatpush.bf16.msra.mxu2 %v1198_v52  ;;  %v1204_v52 = vld [vmem:[%s1518_s7] sm:$0xff] }
  0x22   : > { %609 = vmatpush.bf16.msra.mxu1 %v1189_v11 }
  0x25   : > { %507 = vmatpush.bf16.msra.mxu0 %v1180_v22  ;;  %689 = vmatpush.bf16.msra.mxu2 %v1197_v54 }
  0x26   : > { %610 = vmatpush.bf16.msra.mxu1 %v1188_v23 }
  0x29   : > { %508 = vmatpush.bf16.msra.mxu0 %v1179_v28  ;;  %690 = vmatpush.bf16.msra.mxu2 %v1196_v57 }
  0x2a   : > { %611 = vmatpush.bf16.msra.mxu1 %v1187_v29 }
  0x2c   : > { %509 = vmatmul.bf16.vlgmr.msra.gmra.mxu0 %v435_v30 }
  0x2d   : > { %612 = vmatmul.bf16.vlgmr.msra.gmra.mxu1 %v538_v31  ;;  %691 = vmatpush.bf16.msra.mxu2 %v1195_v59 }
  0x30   : > { %692 = vmatmul.bf16.vlgmr.msra.gmra.mxu2 %v538_v31 }
  0xa9   : > { %v510_v32 = vpop.f32.mrf.mxu0 }
  0xaa   : > { %v613_v33 = vpop.f32.mrf.mxu1  ;;  %v511_v39 = vadd.f32 %v510_v32, %v452_v35  ;;  %v762_v32 = vld [vmem:[#allocation5] sm:$0xff] }
  0xab   : > { %v614_v40 = vadd.f32 %v613_v33, %v555_v36 }
  0xb1   : > { %v512_v37 = vpop.f32.mrf.mxu0 }
  0xb2   : > { %v615_v38 = vpop.f32.mrf.mxu1  ;;  %v513_v41 = vadd.f32 %v512_v37, %v452_v35  ;;  %v763_v37 = vld [vmem:[#allocation5 + $0x8] sm:$0xff] }
  0xb3   : > { %v616_v42 = vadd.f32 %v615_v38, %v555_v36  ;;  %v693_v15 = vpop.f32.mrf.mxu2 }
  0xb4   : > { %v1215_v43 = vpack.c.bf16 %v513_v41, %v511_v39  ;;  %v694_v17 = vadd.f32 %v693_v15, %v635_v16 }
  0xb5   : > { %v618_v44 = vpack.c.bf16 %v616_v42, %v614_v40 }
  0xb6   : > { %1216 = vst [vmem:[#allocation2] sm:$0xff] %v1215_v43  }
  0xb7   : > { %714 = vmatpush.bf16.xpose.msrb.mxu0 %v618_v44 }
  0xbb   : > { %v695_v18 = vpop.f32.mrf.mxu2 }
  0xbc   : > { %v696_v19 = vadd.f32 %v695_v18, %v635_v16 }
  0xbd   : > { %v1203_v45 = vld [vmem:[#allocation2] sm:$0xff] }
  0xbe   : > { %715 = vmatmul.bf16.vlgmr.msrb.gmra.mxu0 %v1203_v45  ;;  %v698_v20 = vpack.c.bf16 %v696_v19, %v694_v17  ;;  %v1211_v45 = vld [vmem:[%s1518_s7 + $0x38] sm:$0xff] }
  0xc0   : > { %802 = vmatpush.bf16.msra.mxu3 %v698_v20 }
  0xc4   : > { %902 = vmatpush.bf16.msrb.mxu3 %v1211_v45 }
  0xc8   : > { %903 = vmatpush.bf16.msrb.mxu3 %v1210_v46 }
  0xcc   : > { %904 = vmatpush.bf16.msrb.mxu3 %v1209_v47 }
  0xd0   : > { %905 = vmatpush.bf16.msrb.mxu3 %v1208_v48 }
  0xd4   : > { %906 = vmatpush.bf16.msrb.mxu3 %v1207_v49 }
  0xd8   : > { %907 = vmatpush.bf16.msrb.mxu3 %v1206_v50 }
  0xdc   : > { %908 = vmatpush.bf16.msrb.mxu3 %v1205_v51 }
  0xe0   : > { %909 = vmatpush.bf16.msrb.mxu3 %v1204_v52 }
 0x13b   : > { %v716_v55 = vpop.f32.mrf.mxu0 }
 0x13c   : > { %v727_v56 = vsel %vm726_vm1, %v716_v55, -inf }
 0x13d   : > { %v732_v58 = vsel %vm731_vm2, %v727_v56, -inf }
 0x13e   : > { %733 = vmax.xlane.f32.xlu0 %v732_v58 }
 0x143   : > { %v718_v60 = vpop.f32.mrf.mxu0 }
 0x144   : > { %v728_v61 = vsel %vm726_vm1, %v718_v60, -inf }
 0x145   : > { %v735_v62 = vsel %vm731_vm2, %v728_v61, -inf }
 0x146   : > { %736 = vmax.xlane.f32.xlu0 %v735_v62 }
 0x1b1   : > { %v734_v2 = vpop.xlane.xlu0 %733 }
 0x1b2   : > { %v738_v3 = vmax.f32 %v729_v1, %v734_v2  ;;  %v853_v2 = vperm.slane %v1429_v34, 3 }
 0x1b4   : > { %v740_v4 = vsub.f32 %v729_v1, %v738_v3  ;;  %813 = vst.msk [vmem:[#allocation4] sm:$0xff] %vm521_vm0, %v738_v3  ;;  %748 = vperm.xlu1 %1244, %v738_v3  }
 0x1b6   : > { %v742_v5 = vmul.f32 1.442695, %v740_v4 }
 0x1b8   : > { %1249 = vpow2.f32 %v742_v5 }
 0x1b9   : > { %v737_v7 = vpop.xlane.xlu0 %736 }
 0x1ba   : > { %v739_v8 = vmax.f32 %v730_v6, %v737_v7 }
 0x1bc   : > { %v741_v9 = vsub.f32 %v730_v6, %v739_v8  ;;  %814 = vst.msk [vmem:[#allocation4 + $0x8] sm:$0xff] %vm521_vm0, %v739_v8  ;;  %753 = vperm.xlu1 %1244, %v739_v8  }
 0x1be   : > { %v1250_v10 = vpop.eup %1249  ;;  %v744_v11 = vmul.f32 1.442695, %v741_v9 }
 0x1bf   : > { %781 = vperm.xlu0 %1245, %v1250_v10   ;;  %v764_v33 = vmul.f32 %v1250_v10, %v762_v32 }
 0x1c0   : > { %1251 = vpow2.f32 %v744_v11 }
 0x1c6   : > { %v1252_v13 = vpop.eup %1251 }
 0x1c7   : > { %786 = vperm.xlu1 %1244, %v1252_v13   ;;  %v765_v38 = vmul.f32 %v1252_v13, %v763_v37 }
 0x226   : > { %v749_v21 = vpop.permute.xlu1 %748 }
 0x227   : > { %v756_v22 = vsub.f32 %v727_v56, %v749_v21 }
 0x229   : > { %v758_v23 = vmul.f32 1.442695, %v756_v22 }
 0x22b   : > { %1253 = vpow2.f32 %v758_v23 }
 0x22e   : > { %v754_v24 = vpop.permute.xlu1 %753 }
 0x22f   : > { %v757_v25 = vsub.f32 %v728_v61, %v754_v24 }
 0x231   : > { %v1254_v26 = vpop.eup %1253  ;;  %v760_v27 = vmul.f32 1.442695, %v757_v25  ;;  %v782_v55 = vpop.permute.xlu0 %781 }
 0x232   : > { %v766_v28 = vsel %vm731_vm2, %v1254_v26, 0.0  ;;  %v789_v57 = vmul.f32 0.0, %v782_v55 }
 0x233   : > { %1255 = vpow2.f32 %v760_v27  ;;  %767 = vadd.xlane.f32.xlu2 %v766_v28 }
 0x239   : > { %v1256_v29 = vpop.eup %1255  ;;  %v787_v54 = vpop.permute.xlu1 %786 }
 0x23a   : > { %v769_v30 = vsel %vm731_vm2, %v1256_v29, 0.0  ;;  %v791_v31 = vpack.c.bf16 %v1256_v29, %v1254_v26  ;;  %v790_v58 = vmul.f32 0.0, %v787_v54 }
 0x23b   : > { %770 = vadd.xlane.f32.xlu2 %v769_v30 }
 0x23c   : > { %1141 = vmatmul.msk.bf16.vlgmr.msra.gmra.mxu3 %vm731_vm2, %v791_v31 }
 0x2a6   : > { %v768_v35 = vpop.xlane.xlu2 %767 }
 0x2a7   : > { %v772_v36 = vadd.f32 %v768_v35, %v764_v33 }
 0x2a9   : > { %775 = vst.msk [vmem:[#allocation5] sm:$0xff] %vm521_vm0, %v772_v36 }
 0x2ae   : > { %v771_v39 = vpop.xlane.xlu2 %770 }
 0x2af   : > { %v773_v40 = vadd.f32 %v771_v39, %v765_v38 }
 0x2b0   : > { %v820_v41 = vld [vmem:[#allocation5] sm:$0xff] }
 0x2b1   : > { %776 = vst.msk [vmem:[#allocation5 + $0x8] sm:$0xff] %vm521_vm0, %v773_v40  ;;  %1257 = vrcp.f32 %v820_v41 }
 0x2b7   : > { %v1258_v42 = vpop.eup %1257 }
 0x2b8   : > { %826 = vperm.xlu2 %1246, %v1258_v42   ;;  %v821_v43 = vld [vmem:[#allocation5 + $0x8] sm:$0xff] }
 0x2b9   : > { %1259 = vrcp.f32 %v821_v43 }
 0x2bf   : > { %v1260_v44 = vpop.eup %1259  ;;  %v804_v53 = vpop.f32.mrf.mxu3 }
 0x2c0   : > { %831 = vperm.xlu1 %1244, %v1260_v44   ;;  %v809_v60 = vadd.f32 %v804_v53, %v789_v57 }
 0x2c7   : > { %v806_v56 = vpop.f32.mrf.mxu3 }
 0x2c8   : > { %v810_v61 = vadd.f32 %v806_v56, %v790_v58 }
 0x312   : > { %v827_v59 = vpop.permute.xlu2 %826 }
 0x313   : > { %v834_v63 = vmul.f32 %v827_v59, %v809_v60 }
 0x332   : > { %v832_v62 = vpop.permute.xlu1 %831 }
 0x333   : > { %v835_v0 = vmul.f32 %v832_v62, %v810_v61 }
 0x335   : > { %v836_v1 = vpack.c.bf16 %v835_v0, %v834_v63 }
 0x337   : > { %910 = vmatmul.bf16.vlgmr.msrb.gmra.mxu3 %v836_v1 }
 0x3ba   : > { %v911_v3 = vpop.f32.mrf.mxu3 }
 0x3bb   : > { %v912_v4 = vadd.f32 %v911_v3, %v853_v2 }
 0x3bd   : > { %v918_v5 = vadd.f32 %v912_v4, %v1402_v12 }
 0x3bf   : > { %920 = vst [vmem:[%s413_s23] sm:$0xff] %v918_v5 }
 0x3c2   : > { %v913_v6 = vpop.f32.mrf.mxu3 }
 0x3c3   : > { %v914_v7 = vadd.f32 %v913_v6, %v853_v2 }
 0x3c5   : > { %v919_v8 = vadd.f32 %v914_v7, %v1407_v14 }
 0x3c7   : > { %921 = vst [vmem:[%s413_s23 + $0x8] sm:$0xff] %v919_v8 }
 0x3c8 PF: > { %s19_s11 = sadd.s32 1, %s1283_s11   ;;  %s1521_s30 = smov %s1279_s10 }
 0x3c9   : > { %p16_p5 = scmp.ge.s32.totalorder %s19_s11, 4   ;;  %s1522_s10 = smov %s1524_s12 }
 0x3cb   :  { %18 = sbr.rel (!%p16_p5) target bundleno = 2 (0x2), region = 97 }

</bundles_post_ra>
